<compile_context>
chip_gen: v6e
topology: v6e:2x2x1
jax: 0.10.0
libtpu: 0.0.40
codegen_flags: <defaults>
</compile_context>

<pallas_src>
import functools

import jax
import jax.numpy as jnp
from jax import lax
from jax.experimental import pallas as pl
from jax.experimental.pallas import tpu as pltpu


def _vmem_cap_bytes():
    """Physical VMEM capacity of the current TPU generation (conservative fallback)."""
    try:
        info = pltpu.get_tpu_info()
        cap = getattr(info, "vmem_capacity_bytes", None)
        if cap:
            return int(cap)
    except Exception:
        pass
    return 64 << 20   # v7x per-TensorCore VMEM (smallest current generation)


def _e2e_kernel(pre_project,
                x_ref, src_ref, dst_ref, dstT_ref, ea_ref, acnt_ref,
                einv_ref, ninv_ref, wp_ref, w1_ref, b1_ref, bnw_ref, bnb_ref,
                a_ref, out_ref):
    f32 = jnp.float32
    bf16 = jnp.bfloat16
    N = x_ref.shape[0]
    E = ea_ref.shape[0]

    x = x_ref[...]                       # [N, node_dim] f32
    ea = ea_ref[...]                     # [E, D] f32
    wp = wp_ref[...]                     # [node_dim, D] f32

    # ---- combined gather one-hot for src+dst, built directly in bf16 ----
    node_iota = lax.broadcasted_iota(jnp.int32, (E, N), 1)
    cmp_src = node_iota == src_ref[...]
    cmp_dst = node_iota == dst_ref[...]
    # integer compares -> int add -> single convert (0/1/2 are exact in bf16)
    oh_sum = (jnp.where(cmp_src, 1, 0) + jnp.where(cmp_dst, 1, 0)).astype(bf16)

    if pre_project:
        # project first when edge_dim < node_dim (fewer FLOPs)
        xp = jnp.dot(x, wp, preferred_element_type=f32)                 # [N, D]
        proj_sum = jnp.dot(oh_sum, xp.astype(bf16),
                           preferred_element_type=f32)                  # [E, D]
    else:
        # gather first when node_dim <= edge_dim
        gath = jnp.dot(oh_sum, x.astype(bf16),
                       preferred_element_type=f32)                      # [E, node_dim]
        proj_sum = jnp.dot(gath, wp, preferred_element_type=f32)        # [E, D]
    fused = ea + proj_sum * 0.5                                         # [E, D] f32

    # ---- line-graph gather+scatter folded into one [E,E] count matmul ----
    # acnt[j, i] = #line-graph edges i -> j  (exact small ints in bf16)
    agg = jnp.dot(acnt_ref[...], fused.astype(bf16),
                  preferred_element_type=f32) * einv_ref[...]           # [E, D] mean

    # ---- edge_update_net: Linear -> PReLU -> BatchNorm1d (train-mode stats) ----
    h = jnp.dot(agg, w1_ref[...], preferred_element_type=f32) + b1_ref[...]
    a = a_ref[0, 0]                                                     # SMEM scalar slope
    h = jnp.where(h >= 0.0, h, a * h)                                   # PReLU
    # single-pass BN statistics: sum and sum-of-squares
    inv_e = 1.0 / E
    s1 = jnp.sum(h, axis=0, keepdims=True)
    s2 = jnp.sum(h * h, axis=0, keepdims=True)
    mean = s1 * inv_e
    var = s2 * inv_e - mean * mean                                      # biased (train-mode)
    hbn = (h - mean) * lax.rsqrt(var + 1e-5) * bnw_ref[...] + bnb_ref[...]

    fused2 = fused + hbn                                                # [E, D] f32

    # ---- scatter-mean by dst into [N, D] (one-hot built pre-transposed, bf16) ----
    node_iota_NE = lax.broadcasted_iota(jnp.int32, (N, E), 0)
    oh_dst_T = jnp.where(node_iota_NE == dstT_ref[...], 1, 0).astype(bf16)
    out_ref[...] = jnp.dot(oh_dst_T, fused2.astype(bf16),
                           preferred_element_type=f32) * ninv_ref[...]


def edge_to_edge_message_passing(x, edge_index, edge_attr, line_graph_edge_index,
                                 w_proj, w1, b1, prelu_a, bn_w, bn_b):
    """Wrapper: topology operators + reciprocals in plain JAX, one pallas_call."""
    N, node_dim = x.shape
    E, D = edge_attr.shape
    L = line_graph_edge_index.shape[1]
    # TODO(synk): the reference module skips edge_update_net entirely when L == 0;
    #             this wrapper assumes L > 0 (as in the demo shapes).

    src = edge_index[0].astype(jnp.int32)
    dst = edge_index[1].astype(jnp.int32)
    lsrc = line_graph_edge_index[0].astype(jnp.int32)
    ldst = line_graph_edge_index[1].astype(jnp.int32)

    # Topology-only operators computed once (reusable across layers/steps):
    #  * A_cnt[j, i] = #line-graph edges i -> j  -> folds gather+scatter into one matmul
    #  * exact scatter-mean reciprocals, applied as broadcast multiplies in-kernel
    a_cnt = jnp.zeros((E, E), jnp.float32).at[ldst, lsrc].add(1.0)
    edge_cnt = a_cnt.sum(axis=1)
    node_cnt = jnp.zeros((N,), jnp.float32).at[dst].add(1.0)
    edge_inv = (1.0 / jnp.maximum(edge_cnt, 1.0)).reshape(E, 1)
    node_inv = (1.0 / jnp.maximum(node_cnt, 1.0)).reshape(N, 1)
    a_cnt_bf = a_cnt.astype(jnp.bfloat16)    # small integer counts: exact in bf16

    # Index columns/rows in the orientation each one-hot needs (no in-kernel transposes).
    src_col = src.reshape(E, 1)
    dst_col = dst.reshape(E, 1)
    dst_row = dst.reshape(1, E)

    b1_2d = b1.reshape(1, D)
    bnw_2d = bn_w.reshape(1, D)
    bnb_2d = bn_b.reshape(1, D)
    a_2d = prelu_a.reshape(1, 1)

    # Pick the matmul order with fewer FLOPs (static, trace-time decision).
    pre_project = D < node_dim

    vmem = pl.BlockSpec(memory_space=pltpu.MemorySpace.VMEM)
    smem = pl.BlockSpec(memory_space=pltpu.MemorySpace.SMEM)

    # Resident-footprint estimate (now includes int32 iota / mask temporaries and
    # the bf16 one-hots/casts), with 2x headroom, capped at 80% of physical VMEM.
    dense_bytes = ((E * N) * (4 + 1 + 1 + 2)     # iota + 2 masks + bf16 oh_sum
                   + (N * E) * (4 + 1 + 2)       # iota + mask + bf16 oh_dst_T
                   + (E * E) * 2)                # bf16 A_cnt
    feat_bytes = (4 * (N * node_dim + N * D + E * node_dim + 7 * E * D + 2 * N * D
                       + node_dim * D + D * D + 8 * D + 3 * E + 2 * N)
                  + 2 * (2 * E * D + E * node_dim + N * D))   # bf16 casts
    vmem_limit = int(2 * (dense_bytes + feat_bytes) + (4 << 20))
    vmem_limit = min(max(vmem_limit, 32 << 20), int(0.8 * _vmem_cap_bytes()))

    kernel = functools.partial(_e2e_kernel, pre_project)

    return pl.pallas_call(
        kernel,
        out_shape=jax.ShapeDtypeStruct((N, D), jnp.float32),
        in_specs=[vmem] * 13 + [smem],
        out_specs=vmem,
        compiler_params=pltpu.CompilerParams(vmem_limit_bytes=vmem_limit),
    )(x, src_col, dst_col, dst_row, edge_attr, a_cnt_bf,
      edge_inv, node_inv, w_proj, w1, b1_2d, bnw_2d, bnb_2d, a_2d)


def reference_jax(x, edge_index, edge_attr, line_graph_edge_index,
                  w_proj, w1, b1, prelu_a, bn_w, bn_b):
    """Pure-JAX f32 reference mirroring the PyTorch forward (train-mode BN)."""
    N = x.shape[0]
    E = edge_attr.shape[0]
    src, dst = edge_index[0], edge_index[1]
    proj_src = x[src] @ w_proj
    proj_dst = x[dst] @ w_proj
    fused = edge_attr + (proj_src + proj_dst) / 2.0

    lsrc, ldst = line_graph_edge_index[0], line_graph_edge_index[1]
    messages = fused[lsrc]
    agg_sum = jnp.zeros_like(fused).at[ldst].add(messages)
    cnt = jnp.zeros((E, 1), jnp.float32).at[ldst].add(1.0)
    agg = agg_sum / jnp.maximum(cnt, 1.0)

    h = agg @ w1 + b1
    h = jnp.where(h >= 0, h, prelu_a * h)
    mean = jnp.mean(h, axis=0, keepdims=True)
    var = jnp.mean((h - mean) ** 2, axis=0, keepdims=True)
    hbn = (h - mean) / jnp.sqrt(var + 1e-5) * bn_w + bn_b
    fused = fused + hbn

    node_sum = jnp.zeros((N, edge_attr.shape[1]), jnp.float32).at[dst].add(fused)
    node_cnt = jnp.zeros((N, 1), jnp.float32).at[dst].add(1.0)
    return node_sum / jnp.maximum(node_cnt, 1.0)


if __name__ == "__main__":
    # Small synthetic shapes consistent with the module.
    N, node_dim, edge_dim = 8, 16, 32
    E, L = 16, 24

    key = jax.random.PRNGKey(0)
    k = jax.random.split(key, 8)

    x = jax.random.normal(k[0], (N, node_dim), dtype=jnp.float32)
    edge_index = jax.random.randint(k[1], (2, E), 0, N, dtype=jnp.int32)
    edge_attr = jax.random.normal(k[2], (E, edge_dim), dtype=jnp.float32)
    line_graph_edge_index = jax.random.randint(k[3], (2, L), 0, E, dtype=jnp.int32)

    # Parameters (deterministic init, PyTorch-default-style where applicable).
    # node_to_edge_proj: Linear(node_dim, edge_dim, bias=False), stored pre-transposed
    # (for node_dim == edge_dim the module is Identity: pass jnp.eye(node_dim)).
    w_proj = jax.random.normal(k[4], (node_dim, edge_dim), dtype=jnp.float32) / jnp.sqrt(node_dim)
    # edge_update_net: Linear(edge_dim, edge_dim) + PReLU + BatchNorm1d(edge_dim)
    w1 = jax.random.normal(k[5], (edge_dim, edge_dim), dtype=jnp.float32) / jnp.sqrt(edge_dim)
    b1 = jax.random.normal(k[6], (edge_dim,), dtype=jnp.float32) * 0.01
    prelu_a = jnp.array(0.25, dtype=jnp.float32)      # PReLU default init
    bn_w = jnp.ones((edge_dim,), dtype=jnp.float32)   # BatchNorm1d default weight
    bn_b = jnp.zeros((edge_dim,), dtype=jnp.float32)  # BatchNorm1d default bias

    out = edge_to_edge_message_passing(
        x, edge_index, edge_attr, line_graph_edge_index,
        w_proj, w1, b1, prelu_a, bn_w, bn_b)
    out = jax.block_until_ready(out)

    ref = reference_jax(
        x, edge_index, edge_attr, line_graph_edge_index,
        w_proj, w1, b1, prelu_a, bn_w, bn_b)
    assert out.shape == (N, edge_dim)
    # bf16 matmul operands (f32 accumulation) vs a pure-f32 reference: check
    # relative L2 error rather than tight elementwise allclose.
    rel_err = jnp.linalg.norm(out - ref) / jnp.maximum(jnp.linalg.norm(ref), 1e-6)
    assert float(rel_err) < 5e-2, f"mismatch vs JAX reference: rel_err={float(rel_err)}"

    print("KERNEL_OK")
</pallas_src>

<mosaic_0001>
module attributes {stable_mosaic.version = 11 : i64} {
  func.func @_e2e_kernel(%arg0: memref<8x16xf32, #tpu.memory_space<vmem>>, %arg1: memref<16x1xi32, #tpu.memory_space<vmem>>, %arg2: memref<16x1xi32, #tpu.memory_space<vmem>>, %arg3: memref<1x16xi32, #tpu.memory_space<vmem>>, %arg4: memref<16x32xf32, #tpu.memory_space<vmem>>, %arg5: memref<16x16xbf16, #tpu.memory_space<vmem>>, %arg6: memref<16x1xf32, #tpu.memory_space<vmem>>, %arg7: memref<8x1xf32, #tpu.memory_space<vmem>>, %arg8: memref<16x32xf32, #tpu.memory_space<vmem>>, %arg9: memref<32x32xf32, #tpu.memory_space<vmem>>, %arg10: memref<1x32xf32, #tpu.memory_space<vmem>>, %arg11: memref<1x32xf32, #tpu.memory_space<vmem>>, %arg12: memref<1x32xf32, #tpu.memory_space<vmem>>, %arg13: memref<1x1xf32, #tpu.memory_space<smem>>, %arg14: memref<8x32xf32, #tpu.memory_space<vmem>>) attributes {dimension_semantics = [], scalar_prefetch = 0 : i64, scratch_operands = 0 : i64, tpu.core_type = #tpu.core_type<tc>} {
    %c0 = arith.constant 0 : index
    %c0_0 = arith.constant 0 : index
    %0 = vector.load %arg0[%c0, %c0_0] : memref<8x16xf32, #tpu.memory_space<vmem>>, vector<8x16xf32>
    %c0_1 = arith.constant 0 : index
    %c0_2 = arith.constant 0 : index
    %1 = vector.load %arg4[%c0_1, %c0_2] : memref<16x32xf32, #tpu.memory_space<vmem>>, vector<16x32xf32>
    %c0_3 = arith.constant 0 : index
    %c0_4 = arith.constant 0 : index
    %2 = vector.load %arg8[%c0_3, %c0_4] : memref<16x32xf32, #tpu.memory_space<vmem>>, vector<16x32xf32>
    %3 = tpu.iota {dimensions = array<i32: 1>} : vector<16x8xi32>
    %c0_5 = arith.constant 0 : index
    %c0_6 = arith.constant 0 : index
    %4 = vector.load %arg1[%c0_5, %c0_6] : memref<16x1xi32, #tpu.memory_space<vmem>>, vector<16x1xi32>
    %5 = vector.broadcast %4 : vector<16x1xi32> to vector<16x8xi32>
    %6 = arith.cmpi eq, %3, %5 : vector<16x8xi32>
    %c0_7 = arith.constant 0 : index
    %c0_8 = arith.constant 0 : index
    %7 = vector.load %arg2[%c0_7, %c0_8] : memref<16x1xi32, #tpu.memory_space<vmem>>, vector<16x1xi32>
    %8 = vector.broadcast %7 : vector<16x1xi32> to vector<16x8xi32>
    %9 = arith.cmpi eq, %3, %8 : vector<16x8xi32>
    %c1_i32 = arith.constant 1 : i32
    %c0_i32 = arith.constant 0 : i32
    %10 = vector.broadcast %c1_i32 : i32 to vector<16x8xi32>
    %11 = vector.broadcast %c0_i32 : i32 to vector<16x8xi32>
    %12 = arith.select %6, %10, %11 : vector<16x8xi1>, vector<16x8xi32>
    %c1_i32_9 = arith.constant 1 : i32
    %c0_i32_10 = arith.constant 0 : i32
    %13 = vector.broadcast %c1_i32_9 : i32 to vector<16x8xi32>
    %14 = vector.broadcast %c0_i32_10 : i32 to vector<16x8xi32>
    %15 = arith.select %9, %13, %14 : vector<16x8xi1>, vector<16x8xi32>
    %16 = arith.addi %12, %15 : vector<16x8xi32>
    %17 = arith.sitofp %16 : vector<16x8xi32> to vector<16x8xbf16>
    %18 = arith.truncf %0 : vector<8x16xf32> to vector<8x16xbf16>
    %cst = arith.constant dense<0.000000e+00> : vector<16x16xf32>
    %19 = tpu.matmul %17, %18, %cst {dimension_numbers = #tpu.dot_dimension_numbers<[1], [0], [0], [1], [0, 0, 1, 1], [], []>} : vector<16x8xbf16>, vector<8x16xbf16>, vector<16x16xf32> -> vector<16x16xf32>
    %cst_11 = arith.constant dense<0.000000e+00> : vector<16x32xf32>
    %20 = tpu.matmul %19, %2, %cst_11 {dimension_numbers = #tpu.dot_dimension_numbers<[1], [0], [0], [1], [0, 0, 1, 1], [], []>} : vector<16x16xf32>, vector<16x32xf32>, vector<16x32xf32> -> vector<16x32xf32>
    %cst_12 = arith.constant 5.000000e-01 : f32
    %21 = vector.broadcast %cst_12 : f32 to vector<16x32xf32>
    %22 = arith.mulf %20, %21 : vector<16x32xf32>
    %23 = arith.addf %1, %22 : vector<16x32xf32>
    %c0_13 = arith.constant 0 : index
    %c0_14 = arith.constant 0 : index
    %24 = vector.load %arg5[%c0_13, %c0_14] : memref<16x16xbf16, #tpu.memory_space<vmem>>, vector<16x16xbf16>
    %25 = arith.truncf %23 : vector<16x32xf32> to vector<16x32xbf16>
    %cst_15 = arith.constant dense<0.000000e+00> : vector<16x32xf32>
    %26 = tpu.matmul %24, %25, %cst_15 {dimension_numbers = #tpu.dot_dimension_numbers<[1], [0], [0], [1], [0, 0, 1, 1], [], []>} : vector<16x16xbf16>, vector<16x32xbf16>, vector<16x32xf32> -> vector<16x32xf32>
    %c0_16 = arith.constant 0 : index
    %c0_17 = arith.constant 0 : index
    %27 = vector.load %arg6[%c0_16, %c0_17] : memref<16x1xf32, #tpu.memory_space<vmem>>, vector<16x1xf32>
    %28 = vector.broadcast %27 : vector<16x1xf32> to vector<16x32xf32>
    %29 = arith.mulf %26, %28 : vector<16x32xf32>
    %c0_18 = arith.constant 0 : index
    %c0_19 = arith.constant 0 : index
    %30 = vector.load %arg9[%c0_18, %c0_19] : memref<32x32xf32, #tpu.memory_space<vmem>>, vector<32x32xf32>
    %cst_20 = arith.constant dense<0.000000e+00> : vector<16x32xf32>
    %31 = tpu.matmul %29, %30, %cst_20 {dimension_numbers = #tpu.dot_dimension_numbers<[1], [0], [0], [1], [0, 0, 1, 1], [], []>} : vector<16x32xf32>, vector<32x32xf32>, vector<16x32xf32> -> vector<16x32xf32>
    %c0_21 = arith.constant 0 : index
    %c0_22 = arith.constant 0 : index
    %32 = vector.load %arg10[%c0_21, %c0_22] : memref<1x32xf32, #tpu.memory_space<vmem>>, vector<1x32xf32>
    %33 = vector.broadcast %32 : vector<1x32xf32> to vector<16x32xf32>
    %34 = arith.addf %31, %33 : vector<16x32xf32>
    %c0_23 = arith.constant 0 : index
    %c0_24 = arith.constant 0 : index
    %35 = memref.load %arg13[%c0_23, %c0_24] : memref<1x1xf32, #tpu.memory_space<smem>>
    %cst_25 = arith.constant 0.000000e+00 : f32
    %36 = vector.broadcast %cst_25 : f32 to vector<16x32xf32>
    %37 = arith.cmpf oge, %34, %36 : vector<16x32xf32>
    %38 = vector.broadcast %35 : f32 to vector<16x32xf32>
    %39 = arith.mulf %38, %34 : vector<16x32xf32>
    %40 = arith.select %37, %34, %39 : vector<16x32xi1>, vector<16x32xf32>
    %cst_26 = arith.constant dense<0.000000e+00> : vector<32xf32>
    %41 = vector.multi_reduction <add>, %40, %cst_26 [0] : vector<16x32xf32> to vector<32xf32>
    %42 = vector.shape_cast %41 : vector<32xf32> to vector<1x32xf32>
    %43 = arith.mulf %40, %40 : vector<16x32xf32>
    %cst_27 = arith.constant dense<0.000000e+00> : vector<32xf32>
    %44 = vector.multi_reduction <add>, %43, %cst_27 [0] : vector<16x32xf32> to vector<32xf32>
    %45 = vector.shape_cast %44 : vector<32xf32> to vector<1x32xf32>
    %cst_28 = arith.constant 6.250000e-02 : f32
    %46 = vector.broadcast %cst_28 : f32 to vector<1x32xf32>
    %47 = arith.mulf %42, %46 : vector<1x32xf32>
    %cst_29 = arith.constant 6.250000e-02 : f32
    %48 = vector.broadcast %cst_29 : f32 to vector<1x32xf32>
    %49 = arith.mulf %45, %48 : vector<1x32xf32>
    %50 = arith.mulf %47, %47 : vector<1x32xf32>
    %51 = arith.subf %49, %50 : vector<1x32xf32>
    %52 = vector.broadcast %47 : vector<1x32xf32> to vector<16x32xf32>
    %53 = arith.subf %40, %52 : vector<16x32xf32>
    %cst_30 = arith.constant 9.99999974E-6 : f32
    %54 = vector.broadcast %cst_30 : f32 to vector<1x32xf32>
    %55 = arith.addf %51, %54 : vector<1x32xf32>
    %56 = math.rsqrt %55 : vector<1x32xf32>
    %57 = vector.broadcast %56 : vector<1x32xf32> to vector<16x32xf32>
    %58 = arith.mulf %53, %57 : vector<16x32xf32>
    %c0_31 = arith.constant 0 : index
    %c0_32 = arith.constant 0 : index
    %59 = vector.load %arg11[%c0_31, %c0_32] : memref<1x32xf32, #tpu.memory_space<vmem>>, vector<1x32xf32>
    %60 = vector.broadcast %59 : vector<1x32xf32> to vector<16x32xf32>
    %61 = arith.mulf %58, %60 : vector<16x32xf32>
    %c0_33 = arith.constant 0 : index
    %c0_34 = arith.constant 0 : index
    %62 = vector.load %arg12[%c0_33, %c0_34] : memref<1x32xf32, #tpu.memory_space<vmem>>, vector<1x32xf32>
    %63 = vector.broadcast %62 : vector<1x32xf32> to vector<16x32xf32>
    %64 = arith.addf %61, %63 : vector<16x32xf32>
    %65 = arith.addf %23, %64 : vector<16x32xf32>
    %66 = tpu.iota {dimensions = array<i32: 0>} : vector<8x16xi32>
    %c0_35 = arith.constant 0 : index
    %c0_36 = arith.constant 0 : index
    %67 = vector.load %arg3[%c0_35, %c0_36] : memref<1x16xi32, #tpu.memory_space<vmem>>, vector<1x16xi32>
    %68 = vector.broadcast %67 : vector<1x16xi32> to vector<8x16xi32>
    %69 = arith.cmpi eq, %66, %68 : vector<8x16xi32>
    %c1_i32_37 = arith.constant 1 : i32
    %c0_i32_38 = arith.constant 0 : i32
    %70 = vector.broadcast %c1_i32_37 : i32 to vector<8x16xi32>
    %71 = vector.broadcast %c0_i32_38 : i32 to vector<8x16xi32>
    %72 = arith.select %69, %70, %71 : vector<8x16xi1>, vector<8x16xi32>
    %73 = arith.sitofp %72 : vector<8x16xi32> to vector<8x16xbf16>
    %74 = arith.truncf %65 : vector<16x32xf32> to vector<16x32xbf16>
    %cst_39 = arith.constant dense<0.000000e+00> : vector<8x32xf32>
    %75 = tpu.matmul %73, %74, %cst_39 {dimension_numbers = #tpu.dot_dimension_numbers<[1], [0], [0], [1], [0, 0, 1, 1], [], []>} : vector<8x16xbf16>, vector<16x32xbf16>, vector<8x32xf32> -> vector<8x32xf32>
    %c0_40 = arith.constant 0 : index
    %c0_41 = arith.constant 0 : index
    %76 = vector.load %arg7[%c0_40, %c0_41] : memref<8x1xf32, #tpu.memory_space<vmem>>, vector<8x1xf32>
    %77 = vector.broadcast %76 : vector<8x1xf32> to vector<8x32xf32>
    %78 = arith.mulf %75, %77 : vector<8x32xf32>
    %c0_42 = arith.constant 0 : index
    %c0_43 = arith.constant 0 : index
    %79 = vector.load %arg14[%c0_42, %c0_43] : memref<8x32xf32, #tpu.memory_space<vmem>>, vector<8x32xf32>
    tpu.vector_store %arg14[%c0_42, %c0_43], %78 {strides = array<i32>} : memref<8x32xf32, #tpu.memory_space<vmem>>, vector<8x32xf32>,
    return
  }
}

</mosaic_0001>

<bundles_post_ra>
// kernel: tpu_custom_call.1
= control target key start
LH: loop header
LB: loop body
LE: loop exit
PB: predicated region body
PF: predicated region fallthrough
CT: control target
= control target key end

     0   :  { %20 = vsyncpa [#allocation4], 0  ;;  %s904_s0 = inlined_call_operand.hbm [shape: f32[8,16], index: 0, kind: input, shape index: {}]   ;;  %s905_s1 = inlined_call_operand.vmem [shape: s32[16,1], index: 1, kind: input, shape index: {}]   ;;  %s906_s2 = inlined_call_operand.vmem [shape: s32[16,1], index: 2, kind: input, shape index: {}]   ;;  %s907_s3 = inlined_call_operand.hbm [shape: s32[1,16], index: 3, kind: input, shape index: {}]   ;;  %s908_s4 = inlined_call_operand.vmem [shape: f32[16,32], index: 4, kind: input, shape index: {}]   ;;  %s909_s5 = inlined_call_operand.hbm [shape: bf16[16,16], index: 5, kind: input, shape index: {}]   ;;  %s910_s6 = inlined_call_operand.vmem [shape: f32[16,1], index: 6, kind: input, shape index: {}]   ;;  %s911_s7 = inlined_call_operand.vmem [shape: f32[8,1], index: 7, kind: input, shape index: {}]   ;;  %s912_s8 = inlined_call_operand.vmem [shape: f32[16,32], index: 8, kind: input, shape index: {}]   ;;  %s913_s9 = inlined_call_operand.vmem [shape: f32[32,32], index: 9, kind: input, shape index: {}]   ;;  %s914_s10 = inlined_call_operand.vmem [shape: f32[1,32], index: 10, kind: input, shape index: {}]   ;;  %s915_s11 = inlined_call_operand.vmem [shape: f32[1,32], index: 11, kind: input, shape index: {}]   ;;  %s916_s12 = inlined_call_operand.vmem [shape: f32[1,32], index: 12, kind: input, shape index: {}]   ;;  %s917_s13 = inlined_call_operand.<no memory space> [shape: f32[1,1], index: 13, kind: input, shape index: {}]   ;;  %s918_s14 = inlined_call_operand.hbm [shape: f32[8,32], index: 14, kind: output, shape index: {}]  }
   0x1   :  { %21 = vsyncpa [#allocation7], 0 }
   0x2   :  { %22 = vsyncpa [#allocation5], 0  ;;  %s720_s29 = smov [#allocation6]   ;;  %s721_s15 = smov [#allocation3]  }
   0x3   :  { %s43_s30 = sshll.u32 %s720_s29, 4  ;;  %s29_s16 = sshll.u32 %s721_s15, 4  ;;  %s44_s30 = int_to_ptr.vmem [resolvable:$true] %s43_s30  ;;  %s30_s16 = int_to_ptr.vmem [resolvable:$true] %s29_s16 }
   0x4   :  { %s642_s17 = scalar_lea.vmem %s44_s30, 16  ;;  %s646_s18 = scalar_lea.vmem %s44_s30, 32 }
   0x5   :  { %p643_p0 = scmp.ne.s32.totalorder %s44_s30, %s642_s17  ;;  %p647_p1 = scmp.lt.s32.totalorder %s44_s30, %s44_s30 }
   0x6   :  { %p648_p2 = scmp.lt.s32.totalorder %s646_s18, %s642_s17 }
   0x8   :  { %p649_p3 = por %p648_p2, %p647_p1 }
   0xa   :  { %p650_p4 = pnand %p649_p3, %p643_p0 }
   0xc   :  { %653 = shalt.err (!%p650_p4)
}
   0xd   :  { %46 = dma.hbm_to_vmem [thread:$0]  %s907_s3, 16, %s44_s30, [#allocation7]  }
   0xe   :  { %s662_s21 = scalar_lea.vmem %s30_s16, 128  ;;  %p667_p6 = scmp.lt.s32.totalorder %s30_s16, %s30_s16 }
   0xf   :  { %p663_p5 = scmp.ne.s32.totalorder %s30_s16, %s662_s21  ;;  %p668_p7 = scmp.lt.s32.totalorder %s662_s21, %s662_s21 }
  0x11   :  { %p669_p8 = por %p668_p7, %p667_p6 }
  0x13   :  { %p670_p9 = pnand %p669_p8, %p663_p5 }
  0x15   :  { %673 = shalt.err (!%p670_p9)
}
  0x16   :  { %32 = dma.hbm_to_vmem [thread:$0]  %s904_s0, 128, %s30_s16, [#allocation4]  }
  0x17   :  { %s722_s24 = smov [#allocation8]  }
  0x18   :  { %s54_s25 = sshll.u32 %s722_s24, 4  ;;  %s55_s25 = int_to_ptr.vmem [resolvable:$true] %s54_s25 }
  0x19   :  { %s682_s26 = scalar_lea.vmem %s55_s25, 128  ;;  %p687_p11 = scmp.lt.s32.totalorder %s55_s25, %s55_s25 }
  0x1a   :  { %p683_p10 = scmp.ne.s32.totalorder %s55_s25, %s682_s26  ;;  %p688_p12 = scmp.lt.s32.totalorder %s682_s26, %s682_s26 }
  0x1c   :  { %p689_p13 = por %p688_p12, %p687_p11 }
  0x1e   :  { %p690_p0 = pnand %p689_p13, %p683_p10 }
  0x20   :  { %693 = shalt.err (!%p690_p0)
}
  0x21   :  { %s723_s3 = smov 64   ;;  %s724_s27 = smov 4  }
  0x22   :  { %60 = dma.hbm_to_vmem [thread:$0]  %s909_s5, 128, %s55_s25, [#allocation7], %s723_s3, %s723_s3, %s724_s27  }
  0x23   :  { %714 = dma.done.wait [#allocation4], 128  }
  0x24   :  { %715 = vsyncadd [#allocation4], 4294967168 }
  0x25   :  { %716 = dma.done.wait [#allocation7], 144  }
  0x26   :  { %717 = vsyncadd [#allocation7], 4294967152  ;;  %v725_v0 = vmov 0   ;;  %v104_v1 = vld [vmem:[%s906_s2] sm:$0xff]  ;;  %v105_v3 = vld [vmem:[%s906_s2 + $0x8] sm:$0xff]  ;;  %vm128_vm0 = vcmask 1043456   ;;  %v92_v12 = vlaneseq  ;;  %v421_v57 = vstv %s917_s13 }
  0x27   :  { %630 = vset.pattern.permute.xlu1 %v725_v0  ;;  %629 = vset.pattern.permute.xlu0 %v725_v0  ;;  %v94_v2 = vld [vmem:[%s905_s1] sm:$0xff]  ;;  %v95_v4 = vld [vmem:[%s905_s1 + $0x8] sm:$0xff]  ;;  %v726_v10 = vmov 0.0   ;;  %vm727_vm1 = vmmov 0   ;;  %vm124_vm6 = vcmask 64512   ;;  %vm173_vm7 = vcmask 130048  }
  0x28   :  { %107 = vperm.xlu1 %630, %v104_v1   ;;  %97 = vperm.xlu0 %629, %v94_v2   ;;  %v87_v5 = vld [vmem:[#allocation3] sm:$0xff]  ;;  %v312_v8 = vld [vmem:[%s910_s6 + $0x8] sm:$0xff]  ;;  %v93_v13 = vand.u32 127, %v92_v12  ;;  %v328_v42 = vld [vmem:[%s913_s9 + $0x18] sm:$0xff]  ;;  %vm336_vm8 = vcmask 261120  }
  0x29   :  { %v123_v6 = vpack.c.bf16 %v87_v5, %v87_v5  ;;  %v311_v9 = vld [vmem:[%s910_s6] sm:$0xff]  ;;  %584 = vmatprep.subr.bf16.mxu0 %v726_v10  ;;  %586 = vmatprep.mubr.msk.bf16.mxu0 %vm727_vm1, %v726_v10  ;;  %v91_v27 = vld [vmem:[%s912_s8 + $0x8] sm:$0xff]  ;;  %v327_v44 = vld [vmem:[%s913_s9 + $0x10] sm:$0xff] }
  0x2a   :  { %v531_v11 = vld [vmem:[%s911_s7] sm:$0xff]  ;;  %590 = vmatprep.subr.mxu1 %v91_v27  ;;  %v89_v35 = vld [vmem:[%s908_s4 + $0x8] sm:$0xff] }
  0x2b   :  { %v130_v7 = vsel %vm128_vm0, %v123_v6, 0  ;;  %591 = vmatpush3.msra.mxu1 %v91_v27  ;;  %v90_v28 = vld [vmem:[%s912_s8] sm:$0xff]  ;;  %v631_v43 = vld [vmem:[#allocation8] sm:$0xff]  }
  0x2c   :  { %110 = vperm.xlu1 %630, %v105_v3   ;;  %100 = vperm.xlu0 %629, %v95_v4   ;;  %v88_v36 = vld [vmem:[%s908_s4] sm:$0xff]  ;;  %v326_v45 = vld [vmem:[%s913_s9 + $0x8] sm:$0xff] }
  0x2d   :  { %585 = vmatpush3.bf16.msra.mxu0 %v130_v7  ;;  %592 = vmatprep.subr.mxu1 %v90_v28  ;;  %v325_v46 = vld [vmem:[%s913_s9] sm:$0xff] }
  0x2e   :  { %614 = vmatprep.subr.bf16.mxu0 %v726_v10  ;;  %593 = vmatpush3.msra.mxu1 %v90_v28  ;;  %v560_v55 = vld [vmem:[%s914_s10] ss:$0 sm:$0xff] }
  0x2f   :  { %597 = vmatprep.subr.bf16.mxu1 %v726_v10 }
  0x30   :  { %320 = vperm.xlu1 %630, %v312_v8   ;;  %315 = vperm.xlu0 %629, %v311_v9  }
  0x34   :  { %534 = vperm.xlu0 %629, %v531_v11  }
  0xa3   :  { %v108_v14 = vpop.permute.xlu1 %107  ;;  %v98_v15 = vpop.permute.xlu0 %97 }
  0xa4   :  { %vm112_vm2 = vcmp.eq.s32.totalorder %v93_v13, %v108_v14  ;;  %vm102_vm3 = vcmp.eq.s32.totalorder %v93_v13, %v98_v15 }
  0xa5   :  { %v116_v16 = vsel %vm112_vm2, 1, %v725_v0  ;;  %v114_v17 = vsel %vm102_vm3, 1, %v725_v0 }
  0xa6   :  { %v118_v20 = vadd.s32 %v116_v16, %v114_v17 }
  0xa7   :  { %v111_v18 = vpop.permute.xlu1 %110  ;;  %v101_v19 = vpop.permute.xlu0 %100 }
  0xa8   :  { %vm113_vm4 = vcmp.eq.s32.totalorder %v93_v13, %v111_v18  ;;  %vm103_vm5 = vcmp.eq.s32.totalorder %v93_v13, %v101_v19  ;;  %v120_v24 = vcvt.s32.f32 %v118_v20 }
  0xa9   :  { %v117_v21 = vsel %vm113_vm4, 1, %v725_v0  ;;  %v115_v22 = vsel %vm103_vm5, 1, %v725_v0 }
  0xaa   :  { %v119_v23 = vadd.s32 %v117_v21, %v115_v22 }
  0xab   :  { %v316_v47 = vpop.permute.xlu0 %315  ;;  %v321_v51 = vpop.permute.xlu1 %320 }
  0xac   :  { %v121_v25 = vcvt.s32.f32 %v119_v23 }
  0xae   :  { %v122_v26 = vpack.c.bf16 %v121_v25, %v120_v24 }
  0xb0   :  { %587 = vmatmul.mubr.msk.bf16.vlgmr.msra.gmra.mxu0 %vm124_vm6, %v122_v26 }
  0xb1   :  { %616 = vmatprep.mubr.msk.bf16.mxu0 %vm727_vm1, %v726_v10 }
 0x170   :  { %v166_v29 = vpop.f32.mrf.mxu0 }
 0x171   :  { %594 = vmatprep.mubr.msk.f32.mxu1 %vm173_vm7, %v166_v29 }
 0x172   :  { %v588_v30 = vpop.f32.mrf.mxu0 }
 0x174   :  { %v169_v31 = vpop.f32.mrf.mxu0 }
 0x175   :  { %595 = vmatmul.mubr.msk.f32.vlgmr.msra.gmra.mxu1 %vm173_vm7, %v169_v31  ;;  %v477_v31 = vshrl.u32 %v92_v12, 7 }
 0x176   :  { %v589_v32 = vpop.f32.mrf.mxu0  ;;  %599 = vmatprep.mubr.msk.bf16.mxu1 %vm727_vm1, %v726_v10 }
 0x177   :  { %v563_v32 = vld [vmem:[%s915_s11] ss:$0 sm:$0xff]  ;;  %s728_s11 = smov [#allocation9]  }
 0x178   :  { %s545_s22 = sshll.u32 %s728_s11, 4  ;;  %s546_s22 = int_to_ptr.vmem [resolvable:$true] %s545_s22 }
 0x179   :  { %p699_p2 = scmp.lt.s32.totalorder %s546_s22, %s546_s22 }
 0x235   :  { %v596_v33 = vpop.f32.mrf.mxu1 }
 0x236   :  { %v256_v34 = vmul.f32 0.5, %v596_v33 }
 0x237   :  { %v246_v37 = vpop.f32.mrf.mxu1 }
 0x238   :  { %v255_v38 = vmul.f32 0.5, %v246_v37  ;;  %v858_v39 = vadd.f32 %v256_v34, %v89_v35  ;;  %v565_v35 = vld [vmem:[#allocation6] ss:$0 sm:$0xff] }
 0x239   :  { %vm483_vm11 = vcmp.eq.s32.totalorder %v477_v31, %v565_v35 }
 0x23a   :  { %v860_v40 = vadd.f32 %v255_v38, %v88_v36  ;;  %v564_v36 = vld [vmem:[%s916_s12] ss:$0 sm:$0xff]  ;;  %s694_s12 = scalar_lea.vmem %s546_s22, 128 }
 0x23b   :  { %p695_p1 = scmp.ne.s32.totalorder %s546_s22, %s694_s12  ;;  %p700_p3 = scmp.lt.s32.totalorder %s694_s12, %s694_s12 }
 0x23c   :  { %v261_v41 = vpack.c.bf16 %v858_v39, %v860_v40 }
 0x23d   :  { %p701_p4 = por %p700_p3, %p699_p2 }
 0x23e   :  { %598 = vmatpush3.bf16.msra.mxu1 %v261_v41 }
 0x23f   :  { %603 = vmatprep.subr.mxu1 %v328_v42  ;;  %p702_p5 = pnand %p701_p4, %p695_p1 }
 0x241   :  { %600 = vmatmul.mubr.msk.bf16.vlgmr.msra.gmra.mxu1 %vm173_vm7, %v631_v43 }
 0x242   :  { %604 = vmatpush3.msra.mxu1 %v328_v42 }
 0x243   :  { %605 = vmatprep.subr.mxu1 %v327_v44 }
 0x244   :  { %606 = vmatpush3.msra.mxu1 %v327_v44  ;;  %v566_v44 = vsel %vm483_vm11, 1.0, %v726_v10 }
 0x245   :  { %607 = vmatprep.subr.mxu1 %v326_v45 }
 0x246   :  { %608 = vmatpush3.msra.mxu1 %v326_v45 }
 0x247   :  { %609 = vmatprep.subr.mxu1 %v325_v46 }
 0x248   :  { %610 = vmatpush3.msra.mxu1 %v325_v46  ;;  %v486_v46 = vpack.c.bf16 %v566_v44, %v566_v44 }
 0x301   :  { %v304_v48 = vpop.f32.mrf.mxu1 }
 0x302   :  { %v323_v49 = vmul.f32 %v316_v47, %v304_v48  ;;  %v535_v47 = vpop.permute.xlu0 %534 }
 0x303   :  { %v601_v50 = vpop.f32.mrf.mxu1 }
 0x304   :  { %611 = vmatprep.mubr.msk.f32.mxu1 %vm336_vm8, %v323_v49 }
 0x305   :  { %v307_v52 = vpop.f32.mrf.mxu1 }
 0x306   :  { %v324_v53 = vmul.f32 %v321_v51, %v307_v52 }
 0x307   :  { %v602_v54 = vpop.f32.mrf.mxu1 }
 0x308   :  { %612 = vmatmul.mubr.msk.f32.vlgmr.msra.gmra.mxu1 %vm336_vm8, %v324_v53 }
 0x3c8   :  { %v613_v56 = vpop.f32.mrf.mxu1 }
 0x3c9   :  { %v415_v58 = vadd.f32 %v613_v56, %v560_v55 }
 0x3ca   :  { %v409_v59 = vpop.f32.mrf.mxu1 }
 0x3cb   :  { %vm420_vm9 = vcmp.ge.f32.partialorder %v415_v58, 0.0  ;;  %v423_v60 = vmul.f32 %v421_v57, %v415_v58  ;;  %v410_v61 = vadd.f32 %v560_v55, %v409_v59 }
 0x3cd   :  { %v425_v62 = vsel %vm420_vm9, %v415_v58, %v423_v60  ;;  %vm419_vm10 = vcmp.ge.f32.partialorder %v410_v61, 0.0  ;;  %v422_v63 = vmul.f32 %v421_v57, %v410_v61 }
 0x3ce   :  { %v436_v0 = vmul.f32 %v425_v62, %v425_v62  ;;  %v427_v2 = vsel %vm336_vm8, %v425_v62, 0.0 }
 0x3cf   :  { %v424_v1 = vsel %vm419_vm10, %v410_v61, %v422_v63 }
 0x3d0   :  { %v426_v3 = vsel %vm336_vm8, %v424_v1, 0.0  ;;  %v435_v4 = vmul.f32 %v424_v1, %v424_v1  ;;  %v438_v6 = vsel %vm336_vm8, %v436_v0, 0.0 }
 0x3d1   :  { %v428_v5 = vadd.f32 %v427_v2, %v426_v3 }
 0x3d2   :  { %v437_v7 = vsel %vm336_vm8, %v435_v4, 0.0 }
 0x3d3   :  { %v429_v8 = vrot.slane %v428_v5, 4  ;;  %v439_v9 = vadd.f32 %v438_v6, %v437_v7 }
 0x3d5   :  { %v430_v11 = vadd.f32 %v429_v8, %v428_v5  ;;  %v440_v13 = vrot.slane %v439_v9, 4 }
 0x3d7   :  { %v431_v14 = vrot.slane %v430_v11, 2  ;;  %v441_v15 = vadd.f32 %v440_v13, %v439_v9 }
 0x3d9   :  { %v432_v16 = vadd.f32 %v431_v14, %v430_v11  ;;  %v442_v17 = vrot.slane %v441_v15, 2 }
 0x3db   :  { %v433_v18 = vrot.slane %v432_v16, 1  ;;  %v443_v19 = vadd.f32 %v442_v17, %v441_v15 }
 0x3dd   :  { %v434_v20 = vadd.f32 %v433_v18, %v432_v16  ;;  %v444_v21 = vrot.slane %v443_v19, 1 }
 0x3df   :  { %v445_v22 = vadd.f32 %v444_v21, %v443_v19  ;;  %v446_v23 = vmul.f32 0.0625, %v434_v20 }
 0x3e1   :  { %v447_v24 = vmul.f32 0.0625, %v445_v22  ;;  %v448_v25 = vmul.f32 %v446_v23, %v446_v23  ;;  %v450_v28 = vsub.f32 %v424_v1, %v446_v23  ;;  %v451_v29 = vsub.f32 %v425_v62, %v446_v23 }
 0x3e3   :  { %v449_v26 = vsub.f32 %v447_v24, %v448_v25 }
 0x3e5   :  { %v452_v27 = vadd.f32 1e-05, %v449_v26 }
 0x3e7   :  { %632 = vrsqrt.f32 %v452_v27 }
 0x3f4   :  { %v633_v30 = vpop.eup %632 }
 0x3f5   :  { %v454_v33 = vmul.f32 %v633_v30, %v450_v28  ;;  %v455_v34 = vmul.f32 %v633_v30, %v451_v29 }
 0x3f7   :  { %v463_v37 = vmul.f32 %v563_v32, %v454_v33  ;;  %v464_v38 = vmul.f32 %v563_v32, %v455_v34 }
 0x3f9   :  { %v472_v41 = vadd.f32 %v564_v36, %v463_v37  ;;  %v473_v42 = vadd.f32 %v564_v36, %v464_v38 }
 0x3fb   :  { %v474_v43 = vadd.f32 %v472_v41, %v860_v40  ;;  %v475_v12 = vadd.f32 %v473_v42, %v858_v39 }
 0x3fd   :  { %v487_v45 = vpack.c.bf16 %v475_v12, %v474_v43 }
 0x3ff   :  { %615 = vmatpush3.bf16.msra.mxu0 %v487_v45 }
 0x402   :  { %617 = vmatmul.mubr.msk.bf16.vlgmr.msra.gmra.mxu0 %vm173_vm7, %v486_v46 }
 0x4c2   :  { %v525_v48 = vpop.f32.mrf.mxu0 }
 0x4c3   :  { %v537_v49 = vmul.f32 %v535_v47, %v525_v48 }
 0x4c4   :  { %v618_v50 = vpop.f32.mrf.mxu0 }
 0x4c5   :  { %538 = vst.msk [vmem:[#allocation9] sm:$0xff] %vm336_vm8, %v537_v49 }
 0x4c6   :  { %v528_v51 = vpop.f32.mrf.mxu0 }
 0x4c7   :  { %705 = shalt.err (!%p702_p5)
}
 0x4c8   :  { %548 = dma.vmem_to_hbm [thread:$0]  %s546_s22, 128, %s918_s14, [#allocation5]   ;;  %v619_v10 = vpop.f32.mrf.mxu0 }
 0x4c9   :  { %718 = dma.done.wait [#allocation5], 128  }
 0x4ca   :  { %719 = vsyncadd [#allocation5], 4294967168 }
 0x4cb   :  { %552 = vsyncpa [#allocation4], 1 }
 0x4cc   :  { %553 = vsyncpa [#allocation7], 1 }
 0x4cd   :  { %554 = vsyncpa [#allocation5], 1 }

</bundles_post_ra>
